<compile_context>
chip_gen: v7x
topology: tpu7x:2x2x1
jax: 0.10.0
libtpu: 0.0.40
codegen_flags: <defaults>
</compile_context>

<pallas_src>
import functools
import math

import jax
import jax.numpy as jnp
from jax.experimental import pallas as pl
from jax.experimental.pallas import tpu as pltpu


# --------------------------------------------------------------------------
# Fused kernel: hidden = relu(A@W0); out = A@hidden; gather rows via one-hot
# matmul; L1 distances + margin hinge + full reduction to a (1,1) loss.
# --------------------------------------------------------------------------
def _gcn_align_kernel(a_ref, w_ref, idx_ref, out_ref, loss_ref, *, gamma, k, t):
    a = a_ref[...]                                           # [N, N] f32

    # layer 1 (featureless, transform=False): pre_sup = W0 ; hidden = relu(A @ W0)
    hidden = jnp.maximum(
        jnp.dot(a, w_ref[...], preferred_element_type=jnp.float32), 0.0)

    # layer 2 (no weight, identity act): outputs = A @ hidden
    out = jnp.dot(a, hidden, preferred_element_type=jnp.float32)   # [N, D]
    out_ref[...] = out.astype(out_ref.dtype)

    # ---- align loss, fully in-kernel -------------------------------------
    # idx layout (built in the wrapper):
    #   [ repeat(ILL0,k) | neg_left | neg2_left | repeat(ILL1,k) | neg_right | neg2_right ]
    # Gather all rows at once with a one-hot matmul on the MXU.
    m_sel = idx_ref.shape[0]                                 # 6 * t * k
    n = a_ref.shape[0]
    col = jax.lax.broadcasted_iota(jnp.int32, (m_sel, n), 1)
    onehot = (col == idx_ref[...]).astype(jnp.float32)       # [m_sel, N]
    g = jnp.dot(onehot, out, preferred_element_type=jnp.float32)  # [m_sel, D]

    half = m_sel // 2
    tk = t * k
    # row-wise L1 distances between the "left" and "right" halves: [3*t*k, 1]
    dist = jnp.sum(jnp.abs(g[:half] - g[half:]), axis=-1, keepdims=True)

    a_gamma = dist[:tk] + gamma            # A (repeated k times per pair) + gamma
    b1 = dist[tk:2 * tk]                   # negatives set 1
    b2 = dist[2 * tk:3 * tk]               # negatives set 2

    l1 = jnp.sum(jnp.maximum(a_gamma - b1, 0.0), axis=0, keepdims=True)  # [1,1]
    l2 = jnp.sum(jnp.maximum(a_gamma - b2, 0.0), axis=0, keepdims=True)  # [1,1]
    loss_ref[...] = (l1 + l2) * (1.0 / (2.0 * k * t))


@functools.partial(jax.jit, static_argnames=("gamma", "k", "t"))
def _fused_forward(support, weight0, ill0, ill1,
                   neg_left, neg_right, neg2_left, neg2_right, *, gamma, k, t):
    n = support.shape[0]
    d = weight0.shape[1]

    # Pack all gather indices into one int32 column vector. ILL indices are
    # repeated k times so every per-negative row has its matching positive
    # distance in the same flat position (no in-kernel reshape needed).
    idx = jnp.concatenate([
        jnp.repeat(ill0.astype(jnp.int32), k),
        neg_left.astype(jnp.int32),
        neg2_left.astype(jnp.int32),
        jnp.repeat(ill1.astype(jnp.int32), k),
        neg_right.astype(jnp.int32),
        neg2_right.astype(jnp.int32),
    ]).reshape(-1, 1)                                        # [6*t*k, 1]

    outputs, loss = pl.pallas_call(
        functools.partial(_gcn_align_kernel,
                          gamma=float(gamma), k=int(k), t=int(t)),
        out_shape=(jax.ShapeDtypeStruct((n, d), jnp.float32),
                   jax.ShapeDtypeStruct((1, 1), jnp.float32)),
        in_specs=[pl.BlockSpec(memory_space=pltpu.MemorySpace.VMEM)] * 3,
        out_specs=(pl.BlockSpec(memory_space=pltpu.MemorySpace.VMEM),
                   pl.BlockSpec(memory_space=pltpu.MemorySpace.VMEM)),
    )(support, weight0, idx)
    return outputs, loss[0, 0]


# --------------------------------------------------------------------------
# GCN_Align_Unit equivalent
# --------------------------------------------------------------------------
class GCNAlignUnit:
    def __init__(self, support, input_dim, output_dim, gamma, neg_k, key):
        # gru1 is featureless + no-transform -> it still gets a glorot weight of
        # shape [input_dim, output_dim]; gru2 has no weight at all.
        init_range = math.sqrt(6.0 / (input_dim + output_dim))
        self.weight0 = jax.random.uniform(
            key, (input_dim, output_dim), jnp.float32, -init_range, init_range)
        self.support = support
        self.gamma = float(gamma)
        self.k = int(neg_k)
        self.outputs = None

    def forward(self, data):
        t = int(data['ILL0'].shape[0])
        outputs, loss = _fused_forward(
            self.support, self.weight0,
            data['ILL0'], data['ILL1'],
            data['neg_left'], data['neg_right'],
            data['neg2_left'], data['neg2_right'],
            gamma=self.gamma, k=self.k, t=t)
        self.outputs = outputs
        return loss

    def get_output(self):
        return self.outputs


# --------------------------------------------------------------------------
# Plain-JAX reference (mirrors the PyTorch code) for a sanity check.
# --------------------------------------------------------------------------
def _reference(support, w0, ill0, ill1, nl, nr, n2l, n2r, gamma, k):
    hp = jax.lax.Precision.HIGHEST
    hidden = jnp.maximum(jnp.dot(support, w0, precision=hp), 0.0)
    out = jnp.dot(support, hidden, precision=hp)
    t = ill0.shape[0]
    A = jnp.sum(jnp.abs(out[ill0] - out[ill1]), 1, keepdims=True)
    B1 = jnp.sum(jnp.abs(out[nl] - out[nr]), 1).reshape(t, k)
    B2 = jnp.sum(jnp.abs(out[n2l] - out[n2r]), 1).reshape(t, k)
    L1 = jnp.maximum(A + gamma - B1, 0.0)
    L2 = jnp.maximum(A + gamma - B2, 0.0)
    return out, (jnp.sum(L1) + jnp.sum(L2)) / (2.0 * k * t)


if __name__ == "__main__":
    key = jax.random.PRNGKey(0)
    N = 128      # number of entities (== input_dim for the featureless layer)
    D = 32       # output embedding dim
    t = 8        # number of aligned (ILL) pairs
    k = 4        # args.neg_triple_num
    gamma = 3.0  # args.gamma

    k_adj, k_w, k_i = jax.random.split(key, 3)

    # synthetic normalized adjacency ("support")
    adj = jax.random.uniform(k_adj, (N, N), jnp.float32)
    adj = jnp.where(adj > 0.9, adj, 0.0) + jnp.eye(N, dtype=jnp.float32)
    support = adj / jnp.sum(adj, axis=1, keepdims=True)

    model = GCNAlignUnit(support, input_dim=N, output_dim=D,
                         gamma=gamma, neg_k=k, key=k_w)

    ki = jax.random.split(k_i, 6)
    data = {
        'ILL0':       jax.random.randint(ki[0], (t,),     0, N, jnp.int32),
        'ILL1':       jax.random.randint(ki[1], (t,),     0, N, jnp.int32),
        'neg_left':   jax.random.randint(ki[2], (t * k,), 0, N, jnp.int32),
        'neg_right':  jax.random.randint(ki[3], (t * k,), 0, N, jnp.int32),
        'neg2_left':  jax.random.randint(ki[4], (t * k,), 0, N, jnp.int32),
        'neg2_right': jax.random.randint(ki[5], (t * k,), 0, N, jnp.int32),
        # 'features' is unused: gru1 is featureless, gru2 consumes gru1's output
    }

    loss = model.forward(data)
    jax.block_until_ready(loss)
    jax.block_until_ready(model.outputs)

    # light sanity check against a plain-JAX reference (loose tolerance: MXU f32)
    ref_out, ref_loss = _reference(support, model.weight0,
                                   data['ILL0'], data['ILL1'],
                                   data['neg_left'], data['neg_right'],
                                   data['neg2_left'], data['neg2_right'],
                                   gamma, k)
    assert jnp.allclose(model.outputs, ref_out, rtol=5e-2, atol=1e-2)
    assert jnp.allclose(loss, ref_loss, rtol=5e-2, atol=1e-2)

    print("KERNEL_OK")
</pallas_src>

<mosaic_0001>
module attributes {stable_mosaic.version = 11 : i64} {
  func.func @_gcn_align_kernel(%arg0: memref<128x128xf32, #tpu.memory_space<vmem>>, %arg1: memref<128x32xf32, #tpu.memory_space<vmem>>, %arg2: memref<192x1xi32, #tpu.memory_space<vmem>>, %arg3: memref<128x32xf32, #tpu.memory_space<vmem>>, %arg4: memref<1x1xf32, #tpu.memory_space<vmem>>) attributes {dimension_semantics = [], scalar_prefetch = 0 : i64, scratch_operands = 0 : i64, tpu.core_type = #tpu.core_type<tc>} {
    %c0 = arith.constant 0 : index
    %c0_0 = arith.constant 0 : index
    %0 = vector.load %arg0[%c0, %c0_0] : memref<128x128xf32, #tpu.memory_space<vmem>>, vector<128x128xf32>
    %c0_1 = arith.constant 0 : index
    %c0_2 = arith.constant 0 : index
    %1 = vector.load %arg1[%c0_1, %c0_2] : memref<128x32xf32, #tpu.memory_space<vmem>>, vector<128x32xf32>
    %cst = arith.constant dense<0.000000e+00> : vector<128x32xf32>
    %2 = tpu.matmul %0, %1, %cst {dimension_numbers = #tpu.dot_dimension_numbers<[1], [0], [0], [1], [0, 0, 1, 1], [], []>} : vector<128x128xf32>, vector<128x32xf32>, vector<128x32xf32> -> vector<128x32xf32>
    %cst_3 = arith.constant 0.000000e+00 : f32
    %3 = vector.broadcast %cst_3 : f32 to vector<128x32xf32>
    %4 = arith.maximumf %2, %3 : vector<128x32xf32>
    %cst_4 = arith.constant dense<0.000000e+00> : vector<128x32xf32>
    %5 = tpu.matmul %0, %4, %cst_4 {dimension_numbers = #tpu.dot_dimension_numbers<[1], [0], [0], [1], [0, 0, 1, 1], [], []>} : vector<128x128xf32>, vector<128x32xf32>, vector<128x32xf32> -> vector<128x32xf32>
    %c0_5 = arith.constant 0 : index
    %c0_6 = arith.constant 0 : index
    %6 = vector.load %arg3[%c0_5, %c0_6] : memref<128x32xf32, #tpu.memory_space<vmem>>, vector<128x32xf32>
    tpu.vector_store %arg3[%c0_5, %c0_6], %5 {strides = array<i32>} : memref<128x32xf32, #tpu.memory_space<vmem>>, vector<128x32xf32>,
    %7 = tpu.iota {dimensions = array<i32: 1>} : vector<192x128xi32>
    %c0_7 = arith.constant 0 : index
    %c0_8 = arith.constant 0 : index
    %8 = vector.load %arg2[%c0_7, %c0_8] : memref<192x1xi32, #tpu.memory_space<vmem>>, vector<192x1xi32>
    %9 = vector.broadcast %8 : vector<192x1xi32> to vector<192x128xi32>
    %10 = arith.cmpi eq, %7, %9 : vector<192x128xi32>
    %11 = arith.extui %10 : vector<192x128xi1> to vector<192x128xi32>
    %12 = arith.sitofp %11 : vector<192x128xi32> to vector<192x128xf32>
    %cst_9 = arith.constant dense<0.000000e+00> : vector<192x32xf32>
    %13 = tpu.matmul %12, %5, %cst_9 {dimension_numbers = #tpu.dot_dimension_numbers<[1], [0], [0], [1], [0, 0, 1, 1], [], []>} : vector<192x128xf32>, vector<128x32xf32>, vector<192x32xf32> -> vector<192x32xf32>
    %14 = vector.extract_strided_slice %13 {offsets = [0, 0], sizes = [96, 32], strides = [1, 1]} : vector<192x32xf32> to vector<96x32xf32>
    %15 = vector.extract_strided_slice %13 {offsets = [96, 0], sizes = [96, 32], strides = [1, 1]} : vector<192x32xf32> to vector<96x32xf32>
    %16 = arith.subf %14, %15 : vector<96x32xf32>
    %17 = math.absf %16 : vector<96x32xf32>
    %cst_10 = arith.constant dense<0.000000e+00> : vector<96xf32>
    %18 = vector.multi_reduction <add>, %17, %cst_10 [1] : vector<96x32xf32> to vector<96xf32>
    %19 = vector.shape_cast %18 : vector<96xf32> to vector<96x1xf32>
    %20 = vector.extract_strided_slice %19 {offsets = [0, 0], sizes = [32, 1], strides = [1, 1]} : vector<96x1xf32> to vector<32x1xf32>
    %cst_11 = arith.constant 3.000000e+00 : f32
    %21 = vector.broadcast %cst_11 : f32 to vector<32x1xf32>
    %22 = arith.addf %20, %21 : vector<32x1xf32>
    %23 = vector.extract_strided_slice %19 {offsets = [32, 0], sizes = [32, 1], strides = [1, 1]} : vector<96x1xf32> to vector<32x1xf32>
    %24 = vector.extract_strided_slice %19 {offsets = [64, 0], sizes = [32, 1], strides = [1, 1]} : vector<96x1xf32> to vector<32x1xf32>
    %25 = arith.subf %22, %23 : vector<32x1xf32>
    %cst_12 = arith.constant 0.000000e+00 : f32
    %26 = vector.broadcast %cst_12 : f32 to vector<32x1xf32>
    %27 = arith.maximumf %25, %26 : vector<32x1xf32>
    %cst_13 = arith.constant dense<0.000000e+00> : vector<1xf32>
    %28 = vector.multi_reduction <add>, %27, %cst_13 [0] : vector<32x1xf32> to vector<1xf32>
    %29 = vector.shape_cast %28 : vector<1xf32> to vector<1x1xf32>
    %30 = arith.subf %22, %24 : vector<32x1xf32>
    %cst_14 = arith.constant 0.000000e+00 : f32
    %31 = vector.broadcast %cst_14 : f32 to vector<32x1xf32>
    %32 = arith.maximumf %30, %31 : vector<32x1xf32>
    %cst_15 = arith.constant dense<0.000000e+00> : vector<1xf32>
    %33 = vector.multi_reduction <add>, %32, %cst_15 [0] : vector<32x1xf32> to vector<1xf32>
    %34 = vector.shape_cast %33 : vector<1xf32> to vector<1x1xf32>
    %35 = arith.addf %29, %34 : vector<1x1xf32>
    %cst_16 = arith.constant 1.562500e-02 : f32
    %36 = vector.broadcast %cst_16 : f32 to vector<1x1xf32>
    %37 = arith.mulf %35, %36 : vector<1x1xf32>
    %c0_17 = arith.constant 0 : index
    %c0_18 = arith.constant 0 : index
    %38 = vector.load %arg4[%c0_17, %c0_18] : memref<1x1xf32, #tpu.memory_space<vmem>>, vector<1x1xf32>
    tpu.vector_store %arg4[%c0_17, %c0_18], %37 {strides = array<i32>} : memref<1x1xf32, #tpu.memory_space<vmem>>, vector<1x1xf32>,
    return
  }
}

</mosaic_0001>

<bundles_post_ra>
// kernel: _fused_forward.1
= control target key start
LH: loop header
LB: loop body
LE: loop exit
PB: predicated region body
PF: predicated region fallthrough
CT: control target
= control target key end

     0   :  { %s1744_s0 = inlined_call_operand.vmem [shape: f32[128,128], index: 0, kind: input, shape index: {}]   ;;  %s1745_s1 = inlined_call_operand.vmem [shape: f32[128,32], index: 1, kind: input, shape index: {}]   ;;  %s1746_s2 = inlined_call_operand.vmem [shape: s32[192,1], index: 2, kind: input, shape index: {}]   ;;  %s1747_s3 = inlined_call_operand.vmem [shape: f32[128,32], index: 3, kind: output, shape index: {0}]   ;;  %s1748_s4 = inlined_call_operand.hbm [shape: f32[1,1], index: 4, kind: output, shape index: {1}]  }
   0x1   :  { %v33_v0 = vld [vmem:[%s1745_s1] sm:$0xff]  ;;  %v34_v1 = vld [vmem:[%s1745_s1 + $0x8] sm:$0xff]  ;;  %v35_v2 = vld [vmem:[%s1745_s1 + $0x10] sm:$0xff] }
   0x2   :  { %v1179_v3 = vpack.c.bf16 %v34_v1, %v33_v0  ;;  %v36_v4 = vld [vmem:[%s1745_s1 + $0x18] sm:$0xff]  ;;  %v37_v6 = vld [vmem:[%s1745_s1 + $0x20] sm:$0xff]  ;;  %v38_v7 = vld [vmem:[%s1745_s1 + $0x28] sm:$0xff] }
   0x3   :  { %v1183_v5 = vpack.c.bf16 %v36_v4, %v35_v2  ;;  %v1187_v8 = vpack.c.bf16 %v38_v7, %v37_v6  ;;  %v17_v9 = vld [vmem:[%s1744_s0] sm:$0xff]  ;;  %v39_v10 = vld [vmem:[%s1745_s1 + $0x30] sm:$0xff]  ;;  %v40_v11 = vld [vmem:[%s1745_s1 + $0x38] sm:$0xff] }
   0x4   :  { %1180 = vmatprep.subr.bf16.mxu0 %v1179_v3  ;;  %1031 = vmatprep.mubr.f32.mxu0 %v17_v9  ;;  %v1191_v12 = vpack.c.bf16 %v40_v11, %v39_v10  ;;  %v41_v13 = vld [vmem:[%s1745_s1 + $0x40] sm:$0xff]  ;;  %v42_v14 = vld [vmem:[%s1745_s1 + $0x48] sm:$0xff] }
   0x5   :  { %1182 = vmatpush3.bf16.msra.mxu0 %v1179_v3  ;;  %1087 = vmatprep.mubr.f32.mxu1 %v17_v9 }
   0x6   :  { %1184 = vmatprep.subr.bf16.mxu0 %v1183_v5 }
   0x9   :  { %1186 = vmatpush3.bf16.msra.mxu0 %v1183_v5 }
   0xa   :  { %1188 = vmatprep.subr.bf16.mxu0 %v1187_v8 }
   0xb   :  { %10 = vsyncpa [#allocation3], 0  ;;  %v1195_v15 = vpack.c.bf16 %v42_v14, %v41_v13  ;;  %v43_v16 = vld [vmem:[%s1745_s1 + $0x50] sm:$0xff]  ;;  %v44_v17 = vld [vmem:[%s1745_s1 + $0x58] sm:$0xff]  ;;  %v1320_v42 = vmov 0   ;;  %vm355_vm2 = vcmask 261120  }
   0xc   :  { %v1199_v18 = vpack.c.bf16 %v44_v17, %v43_v16  ;;  %v45_v19 = vld [vmem:[%s1745_s1 + $0x60] sm:$0xff]  ;;  %v46_v20 = vld [vmem:[%s1745_s1 + $0x68] sm:$0xff]  ;;  %v47_v22 = vld [vmem:[%s1745_s1 + $0x70] sm:$0xff]  ;;  %1295 = vset.pattern.permute.xlu1 %v1320_v42  ;;  %1294 = vset.pattern.permute.xlu0 %v1320_v42 }
   0xd   :  { %1190 = vmatpush3.bf16.msra.mxu0 %v1187_v8  ;;  %v1203_v21 = vpack.c.bf16 %v46_v20, %v45_v19  ;;  %v48_v23 = vld [vmem:[%s1745_s1 + $0x78] sm:$0xff]  ;;  %v1402_v25 = vld [vmem:[%s1744_s0 + $0x8] sm:$0xff]  ;;  %v1407_v26 = vld [vmem:[%s1744_s0 + $0x10] sm:$0xff] }
   0xe   :  { %1192 = vmatprep.subr.bf16.mxu0 %v1191_v12  ;;  %v1207_v24 = vpack.c.bf16 %v48_v23, %v47_v22  ;;  %v1414_v27 = vld [vmem:[%s1744_s0 + $0x18] sm:$0xff]  ;;  %v1419_v28 = vld [vmem:[%s1744_s0 + $0x20] sm:$0xff]  ;;  %v1426_v29 = vld [vmem:[%s1744_s0 + $0x28] sm:$0xff] }
   0xf   :  { %v1431_v30 = vld [vmem:[%s1744_s0 + $0x30] sm:$0xff]  ;;  %v1438_v31 = vld [vmem:[%s1744_s0 + $0x38] sm:$0xff]  ;;  %v1443_v32 = vld [vmem:[%s1744_s0 + $0x40] sm:$0xff] }
  0x10   :  { %v1450_v33 = vld [vmem:[%s1744_s0 + $0x48] sm:$0xff]  ;;  %v1455_v34 = vld [vmem:[%s1744_s0 + $0x50] sm:$0xff]  ;;  %v1462_v35 = vld [vmem:[%s1744_s0 + $0x58] sm:$0xff] }
  0x11   :  { %1194 = vmatpush3.bf16.msra.mxu0 %v1191_v12  ;;  %v1467_v36 = vld [vmem:[%s1744_s0 + $0x60] sm:$0xff]  ;;  %v1474_v37 = vld [vmem:[%s1744_s0 + $0x68] sm:$0xff]  ;;  %v1479_v38 = vld [vmem:[%s1744_s0 + $0x70] sm:$0xff] }
  0x12   :  { %1196 = vmatprep.subr.bf16.mxu0 %v1195_v15  ;;  %v1486_v39 = vld [vmem:[%s1744_s0 + $0x78] sm:$0xff]  ;;  %v375_v40 = vld [vmem:[%s1746_s2 + $0x8] sm:$0xff]  ;;  %v374_v41 = vld [vmem:[%s1746_s2] sm:$0xff] }
  0x13   :  { %402 = vperm.xlu1 %1295, %v375_v40   ;;  %399 = vperm.xlu0 %1294, %v374_v41   ;;  %v387_v43 = vld [vmem:[%s1746_s2 + $0x68] sm:$0xff]  ;;  %v386_v44 = vld [vmem:[%s1746_s2 + $0x60] sm:$0xff]  ;;  %v388_v45 = vld [vmem:[%s1746_s2 + $0x70] sm:$0xff] }
  0x14   :  { %v376_v46 = vld [vmem:[%s1746_s2 + $0x10] sm:$0xff]  ;;  %v389_v47 = vld [vmem:[%s1746_s2 + $0x78] sm:$0xff]  ;;  %v390_v49 = vld [vmem:[%s1746_s2 + $0x80] sm:$0xff] }
  0x15   :  { %1198 = vmatpush3.bf16.msra.mxu0 %v1195_v15  ;;  %v377_v48 = vld [vmem:[%s1746_s2 + $0x18] sm:$0xff]  ;;  %v378_v50 = vld [vmem:[%s1746_s2 + $0x20] sm:$0xff]  ;;  %v391_v51 = vld [vmem:[%s1746_s2 + $0x88] sm:$0xff] }
  0x16   :  { %1200 = vmatprep.subr.bf16.mxu0 %v1199_v18  ;;  %v379_v52 = vld [vmem:[%s1746_s2 + $0x28] sm:$0xff]  ;;  %v392_v53 = vld [vmem:[%s1746_s2 + $0x90] sm:$0xff]  ;;  %v393_v55 = vld [vmem:[%s1746_s2 + $0x98] sm:$0xff] }
  0x17   :  { %438 = vperm.xlu1 %1295, %v387_v43   ;;  %435 = vperm.xlu0 %1294, %v386_v44   ;;  %v380_v54 = vld [vmem:[%s1746_s2 + $0x30] sm:$0xff]  ;;  %v381_v56 = vld [vmem:[%s1746_s2 + $0x38] sm:$0xff]  ;;  %v394_v57 = vld [vmem:[%s1746_s2 + $0xa0] sm:$0xff] }
  0x18   :  { %v382_v58 = vld [vmem:[%s1746_s2 + $0x40] sm:$0xff]  ;;  %v395_v59 = vld [vmem:[%s1746_s2 + $0xa8] sm:$0xff]  ;;  %v396_v61 = vld [vmem:[%s1746_s2 + $0xb0] sm:$0xff] }
  0x19   :  { %1202 = vmatpush3.bf16.msra.mxu0 %v1199_v18  ;;  %v383_v60 = vld [vmem:[%s1746_s2 + $0x48] sm:$0xff]  ;;  %v384_v62 = vld [vmem:[%s1746_s2 + $0x50] sm:$0xff]  ;;  %v397_v63 = vld [vmem:[%s1746_s2 + $0xb8] sm:$0xff] }
  0x1a   :  { %1204 = vmatprep.subr.bf16.mxu0 %v1203_v21  ;;  %v385_v0 = vld [vmem:[%s1746_s2 + $0x58] sm:$0xff] }
  0x1b   :  { %441 = vperm.xlu1 %1295, %v388_v45   ;;  %405 = vperm.xlu0 %1294, %v376_v46  }
  0x1d   :  { %1206 = vmatpush3.bf16.msra.mxu0 %v1203_v21 }
  0x1e   :  { %1208 = vmatprep.subr.bf16.mxu0 %v1207_v24 }
  0x1f   :  { %444 = vperm.xlu1 %1295, %v389_v47   ;;  %408 = vperm.xlu0 %1294, %v377_v48  }
  0x21   :  { %1210 = vmatpush3.bf16.msra.mxu0 %v1207_v24 }
  0x23   :  { %447 = vperm.xlu1 %1295, %v390_v49   ;;  %411 = vperm.xlu0 %1294, %v378_v50  }
  0x24   :  { %1032 = vmatmul.mubr.f32.vlgmr.msra.gmra.mrb[0].mxu0 %v1402_v25 }
  0x25   :  { %1034 = vmatprep.mubr.f32.mxu0 %v1407_v26 }
  0x27   :  { %450 = vperm.xlu1 %1295, %v391_v51   ;;  %414 = vperm.xlu0 %1294, %v379_v52  }
  0x28   :  { %1035 = vmatmul.mubr.f32.gmra.mrb[2].mxu0 %v1414_v27 }
  0x29   :  { %1037 = vmatprep.mubr.f32.mxu0 %v1419_v28 }
  0x2b   :  { %453 = vperm.xlu1 %1295, %v392_v53   ;;  %417 = vperm.xlu0 %1294, %v380_v54  }
  0x2c   :  { %1038 = vmatmul.mubr.f32.gmra.mrb[4].mxu0 %v1426_v29 }
  0x2d   :  { %1040 = vmatprep.mubr.f32.mxu0 %v1431_v30 }
  0x2f   :  { %456 = vperm.xlu1 %1295, %v393_v55   ;;  %420 = vperm.xlu0 %1294, %v381_v56  }
  0x30   :  { %1041 = vmatmul.mubr.f32.gmra.mrb[6].mxu0 %v1438_v31 }
  0x31   :  { %1043 = vmatprep.mubr.f32.mxu0 %v1443_v32 }
  0x33   :  { %459 = vperm.xlu1 %1295, %v394_v57   ;;  %423 = vperm.xlu0 %1294, %v382_v58  }
  0x34   :  { %1044 = vmatmul.mubr.f32.gmra.mrb[8].mxu0 %v1450_v33 }
  0x35   :  { %1046 = vmatprep.mubr.f32.mxu0 %v1455_v34 }
  0x37   :  { %462 = vperm.xlu1 %1295, %v395_v59   ;;  %426 = vperm.xlu0 %1294, %v383_v60  }
  0x38   :  { %1047 = vmatmul.mubr.f32.gmra.mrb[10].mxu0 %v1462_v35 }
  0x39   :  { %1049 = vmatprep.mubr.f32.mxu0 %v1467_v36 }
  0x3b   :  { %465 = vperm.xlu1 %1295, %v396_v61   ;;  %429 = vperm.xlu0 %1294, %v384_v62  }
  0x3c   :  { %1050 = vmatmul.mubr.f32.gmra.mrb[12].mxu0 %v1474_v37 }
  0x3d   :  { %1052 = vmatprep.mubr.f32.mxu0 %v1479_v38 }
  0x3f   :  { %468 = vperm.xlu1 %1295, %v397_v63   ;;  %432 = vperm.xlu0 %1294, %v385_v0  }
  0x40   :  { %1053 = vmatmul.mubr.f32.gmra.mrb[14].mxu0 %v1486_v39 }
  0xf7   :  { %v1033_v1 = vpop.f32.mrb[0].mxu0 }
  0xf8   :  { %v195_v2 = vmax.f32 %v1033_v1, 0.0  ;;  %v115_v3 = vpop.f32.mrb[1].mxu0 }
  0xf9   :  { %v194_v4 = vmax.f32 %v115_v3, 0.0 }
  0xfb   :  { %v1036_v5 = vpop.f32.mrb[2].mxu0  ;;  %v1211_v6 = vpack.c.bf16 %v195_v2, %v194_v4 }
  0xfc   :  { %v197_v7 = vmax.f32 %v1036_v5, 0.0  ;;  %v125_v8 = vpop.f32.mrb[3].mxu0 }
  0xfd   :  { %v196_v9 = vmax.f32 %v125_v8, 0.0  ;;  %1212 = vmatprep.subr.bf16.mxu1 %v1211_v6 }
  0xfe   :  { %1214 = vmatpush3.bf16.msra.mxu1 %v1211_v6 }
  0xff   :  { %v1215_v10 = vpack.c.bf16 %v197_v7, %v196_v9  ;;  %v1039_v11 = vpop.f32.mrb[4].mxu0 }
 0x100   :  { %v199_v12 = vmax.f32 %v1039_v11, 0.0  ;;  %v135_v13 = vpop.f32.mrb[5].mxu0 }
 0x101   :  { %v198_v14 = vmax.f32 %v135_v13, 0.0  ;;  %1216 = vmatprep.subr.bf16.mxu1 %v1215_v10 }
 0x102   :  { %1218 = vmatpush3.bf16.msra.mxu1 %v1215_v10 }
 0x103   :  { %v1219_v15 = vpack.c.bf16 %v199_v12, %v198_v14  ;;  %v1042_v16 = vpop.f32.mrb[6].mxu0 }
 0x104   :  { %v201_v17 = vmax.f32 %v1042_v16, 0.0  ;;  %v145_v18 = vpop.f32.mrb[7].mxu0 }
 0x105   :  { %v200_v19 = vmax.f32 %v145_v18, 0.0  ;;  %1220 = vmatprep.subr.bf16.mxu1 %v1219_v15 }
 0x106   :  { %1222 = vmatpush3.bf16.msra.mxu1 %v1219_v15 }
 0x107   :  { %v1223_v20 = vpack.c.bf16 %v201_v17, %v200_v19  ;;  %v1045_v21 = vpop.f32.mrb[8].mxu0 }
 0x108   :  { %v203_v22 = vmax.f32 %v1045_v21, 0.0  ;;  %v155_v23 = vpop.f32.mrb[9].mxu0 }
 0x109   :  { %v202_v24 = vmax.f32 %v155_v23, 0.0  ;;  %1224 = vmatprep.subr.bf16.mxu1 %v1223_v20 }
 0x10a   :  { %1226 = vmatpush3.bf16.msra.mxu1 %v1223_v20 }
 0x10b   :  { %v1227_v40 = vpack.c.bf16 %v203_v22, %v202_v24  ;;  %v1048_v41 = vpop.f32.mrb[10].mxu0 }
 0x10c   :  { %v205_v42 = vmax.f32 %v1048_v41, 0.0  ;;  %v165_v43 = vpop.f32.mrb[11].mxu0 }
 0x10d   :  { %v204_v44 = vmax.f32 %v165_v43, 0.0  ;;  %1228 = vmatprep.subr.bf16.mxu1 %v1227_v40 }
 0x10e   :  { %1230 = vmatpush3.bf16.msra.mxu1 %v1227_v40 }
 0x10f   :  { %v1231_v45 = vpack.c.bf16 %v205_v42, %v204_v44  ;;  %v1051_v46 = vpop.f32.mrb[12].mxu0 }
 0x110   :  { %v207_v47 = vmax.f32 %v1051_v46, 0.0  ;;  %v175_v48 = vpop.f32.mrb[13].mxu0 }
 0x111   :  { %v206_v49 = vmax.f32 %v175_v48, 0.0  ;;  %1232 = vmatprep.subr.bf16.mxu1 %v1231_v45 }
 0x112   :  { %1234 = vmatpush3.bf16.msra.mxu1 %v1231_v45 }
 0x113   :  { %v1235_v50 = vpack.c.bf16 %v207_v47, %v206_v49  ;;  %v1054_v51 = vpop.f32.mrb[14].mxu0 }
 0x114   :  { %v209_v52 = vmax.f32 %v1054_v51, 0.0  ;;  %v185_v53 = vpop.f32.mrb[15].mxu0 }
 0x115   :  { %v208_v54 = vmax.f32 %v185_v53, 0.0  ;;  %1236 = vmatprep.subr.bf16.mxu1 %v1235_v50 }
 0x116   :  { %1238 = vmatpush3.bf16.msra.mxu1 %v1235_v50 }
 0x117   :  { %v1239_v55 = vpack.c.bf16 %v209_v52, %v208_v54 }
 0x119   :  { %1240 = vmatprep.subr.bf16.mxu1 %v1239_v55 }
 0x11a   :  { %1242 = vmatpush3.bf16.msra.mxu1 %v1239_v55 }
 0x11d   :  { %1088 = vmatmul.mubr.f32.vlgmr.msra.gmra.mrb[0].mxu1 %v1402_v25  ;;  %v372_v25 = vlaneseq }
 0x11e   :  { %1090 = vmatprep.mubr.f32.mxu1 %v1407_v26  ;;  %v400_v26 = vpop.permute.xlu0 %399 }
 0x121   :  { %1091 = vmatmul.mubr.f32.gmra.mrb[2].mxu1 %v1414_v27  ;;  %v1576_v27 = vand.u32 127, %v372_v25 }
 0x122   :  { %1093 = vmatprep.mubr.f32.mxu1 %v1419_v28  ;;  %v436_v28 = vpop.permute.xlu0 %435 }
 0x123   :  { %vm470_vm0 = vcmp.eq.s32.totalorder %v1576_v27, %v400_v26  ;;  %vm482_vm1 = vcmp.eq.s32.totalorder %v1576_v27, %v436_v28 }
 0x125   :  { %1094 = vmatmul.mubr.f32.gmra.mrb[4].mxu1 %v1426_v29  ;;  %v1321_v29 = vmov 1.0  }
 0x126   :  { %1096 = vmatprep.mubr.f32.mxu1 %v1431_v30  ;;  %1143 = vmatprep.mubr.msk.f32.mxu0 %vm470_vm0, %v1321_v29  ;;  %v1582_v30 = vpop.permute.xlu1 %402 }
 0x127   :  { %vm471_vm3 = vcmp.eq.s32.totalorder %v1576_v27, %v1582_v30 }
 0x129   :  { %1097 = vmatmul.mubr.f32.gmra.mrb[6].mxu1 %v1438_v31 }
 0x12a   :  { %1099 = vmatprep.mubr.f32.mxu1 %v1443_v32  ;;  %v1584_v31 = vpop.permute.xlu1 %438 }
 0x12b   :  { %vm483_vm4 = vcmp.eq.s32.totalorder %v1576_v27, %v1584_v31 }
 0x12d   :  { %1100 = vmatmul.mubr.f32.gmra.mrb[8].mxu1 %v1450_v33  ;;  %v1588_v33 = vpop.permute.xlu0 %405 }
 0x12e   :  { %1102 = vmatprep.mubr.f32.mxu1 %v1455_v34  ;;  %v1586_v32 = vpop.permute.xlu1 %441  ;;  %vm472_vm6 = vcmp.eq.s32.totalorder %v1576_v27, %v1588_v33 }
 0x12f   :  { %vm484_vm5 = vcmp.eq.s32.totalorder %v1576_v27, %v1586_v32 }
 0x131   :  { %1103 = vmatmul.mubr.f32.gmra.mrb[10].mxu1 %v1462_v35 }
 0x132   :  { %1105 = vmatprep.mubr.f32.mxu1 %v1467_v36 }
 0x135   :  { %1106 = vmatmul.mubr.f32.gmra.mrb[12].mxu1 %v1474_v37  ;;  %v1598_v37 = vpop.permute.xlu1 %444 }
 0x136   :  { %1108 = vmatprep.mubr.f32.mxu1 %v1479_v38  ;;  %v1600_v38 = vpop.permute.xlu0 %408  ;;  %vm485_vm7 = vcmp.eq.s32.totalorder %v1576_v27, %v1598_v37 }
 0x137   :  { %vm473_vm8 = vcmp.eq.s32.totalorder %v1576_v27, %v1600_v38 }
 0x139   :  { %1109 = vmatmul.mubr.f32.gmra.mrb[14].mxu1 %v1486_v39  ;;  %v1610_v59 = vpop.permute.xlu1 %447 }
 0x13a   :  { %1161 = vmatprep.mubr.msk.f32.mxu1 %vm482_vm1, %v1321_v29  ;;  %v1616_v61 = vpop.permute.xlu0 %411  ;;  %vm486_vm9 = vcmp.eq.s32.totalorder %v1576_v27, %v1610_v59 }
 0x13b   :  { %vm474_vm10 = vcmp.eq.s32.totalorder %v1576_v27, %v1616_v61 }
 0x13d   :  { %v1630_v2 = vpop.permute.xlu1 %450 }
 0x13e   :  { %v1632_v3 = vpop.permute.xlu0 %414  ;;  %vm487_vm11 = vcmp.eq.s32.totalorder %v1576_v27, %v1630_v2 }
 0x13f   :  { %vm475_vm12 = vcmp.eq.s32.totalorder %v1576_v27, %v1632_v3 }
 0x141   :  { %v454_v8 = vpop.permute.xlu1 %453 }
 0x142   :  { %v418_v10 = vpop.permute.xlu0 %417  ;;  %vm488_vm13 = vcmp.eq.s32.totalorder %v1576_v27, %v454_v8 }
 0x143   :  { %vm476_vm14 = vcmp.eq.s32.totalorder %v1576_v27, %v418_v10 }
 0x145   :  { %v457_v15 = vpop.permute.xlu1 %456 }
 0x146   :  { %v421_v16 = vpop.permute.xlu0 %420  ;;  %vm489_vm15 = vcmp.eq.s32.totalorder %v1576_v27, %v457_v15 }
 0x147   :  { %vm477_vm0 = vcmp.eq.s32.totalorder %v1576_v27, %v421_v16 }
 0x149   :  { %v460_v20 = vpop.permute.xlu1 %459 }
 0x14a   :  { %v424_v21 = vpop.permute.xlu0 %423  ;;  %vm490_vm1 = vcmp.eq.s32.totalorder %v1576_v27, %v460_v20 }
 0x14d   :  { %v463_v22 = vpop.permute.xlu1 %462 }
 0x14e   :  { %v427_v23 = vpop.permute.xlu0 %426 }
 0x151   :  { %v466_v24 = vpop.permute.xlu1 %465 }
 0x152   :  { %v430_v40 = vpop.permute.xlu0 %429 }
 0x155   :  { %v469_v41 = vpop.permute.xlu1 %468 }
 0x156   :  { %v433_v42 = vpop.permute.xlu0 %432 }
 0x1f0   :  { %v1089_v34 = vpop.f32.mrb[0].mxu1 }
 0x1f1   :  { %357 = vst.msk [vmem:[%s1747_s3 + $0x8] sm:$0xff] %vm355_vm2, %v1089_v34  ;;  %v276_v35 = vpop.f32.mrb[1].mxu1 }
 0x1f2   :  { %356 = vst.msk [vmem:[%s1747_s3] sm:$0xff] %vm355_vm2, %v276_v35  ;;  %v1243_v36 = vpack.c.bf16 %v1089_v34, %v276_v35 }
 0x1f4   :  { %v1092_v39 = vpop.f32.mrb[2].mxu1  ;;  %1244 = vmatprep.subr.bf16.mxu0 %v1243_v36  ;;  %1275 = vmatprep.subr.bf16.mxu1 %v1243_v36 }
 0x1f5   :  { %359 = vst.msk [vmem:[%s1747_s3 + $0x18] sm:$0xff] %vm355_vm2, %v1092_v39  ;;  %v286_v56 = vpop.f32.mrb[3].mxu1  ;;  %1246 = vmatpush3.bf16.msra.mxu0 %v1243_v36  ;;  %1283 = vmatpush3.bf16.msra.mxu1 %v1243_v36 }
 0x1f6   :  { %358 = vst.msk [vmem:[%s1747_s3 + $0x10] sm:$0xff] %vm355_vm2, %v286_v56  ;;  %v1247_v57 = vpack.c.bf16 %v1092_v39, %v286_v56 }
 0x1f8   :  { %v1095_v58 = vpop.f32.mrb[4].mxu1  ;;  %1248 = vmatprep.subr.bf16.mxu0 %v1247_v57  ;;  %1276 = vmatprep.subr.bf16.mxu1 %v1247_v57 }
 0x1f9   :  { %361 = vst.msk [vmem:[%s1747_s3 + $0x28] sm:$0xff] %vm355_vm2, %v1095_v58  ;;  %v296_v60 = vpop.f32.mrb[5].mxu1  ;;  %1250 = vmatpush3.bf16.msra.mxu0 %v1247_v57  ;;  %1284 = vmatpush3.bf16.msra.mxu1 %v1247_v57 }
 0x1fa   :  { %360 = vst.msk [vmem:[%s1747_s3 + $0x20] sm:$0xff] %vm355_vm2, %v296_v60  ;;  %v1251_v62 = vpack.c.bf16 %v1095_v58, %v296_v60 }
 0x1fc   :  { %v1098_v63 = vpop.f32.mrb[6].mxu1  ;;  %1252 = vmatprep.subr.bf16.mxu0 %v1251_v62  ;;  %1277 = vmatprep.subr.bf16.mxu1 %v1251_v62 }
 0x1fd   :  { %363 = vst.msk [vmem:[%s1747_s3 + $0x38] sm:$0xff] %vm355_vm2, %v1098_v63  ;;  %v306_v0 = vpop.f32.mrb[7].mxu1  ;;  %1254 = vmatpush3.bf16.msra.mxu0 %v1251_v62  ;;  %1285 = vmatpush3.bf16.msra.mxu1 %v1251_v62 }
 0x1fe   :  { %362 = vst.msk [vmem:[%s1747_s3 + $0x30] sm:$0xff] %vm355_vm2, %v306_v0  ;;  %v1255_v1 = vpack.c.bf16 %v1098_v63, %v306_v0 }
 0x200   :  { %v1101_v4 = vpop.f32.mrb[8].mxu1  ;;  %1256 = vmatprep.subr.bf16.mxu0 %v1255_v1  ;;  %1278 = vmatprep.subr.bf16.mxu1 %v1255_v1 }
 0x201   :  { %365 = vst.msk [vmem:[%s1747_s3 + $0x48] sm:$0xff] %vm355_vm2, %v1101_v4  ;;  %v316_v5 = vpop.f32.mrb[9].mxu1  ;;  %1258 = vmatpush3.bf16.msra.mxu0 %v1255_v1  ;;  %1286 = vmatpush3.bf16.msra.mxu1 %v1255_v1 }
 0x202   :  { %364 = vst.msk [vmem:[%s1747_s3 + $0x40] sm:$0xff] %vm355_vm2, %v316_v5  ;;  %v1259_v6 = vpack.c.bf16 %v1101_v4, %v316_v5 }
 0x204   :  { %v1104_v7 = vpop.f32.mrb[10].mxu1  ;;  %1260 = vmatprep.subr.bf16.mxu0 %v1259_v6  ;;  %1279 = vmatprep.subr.bf16.mxu1 %v1259_v6 }
 0x205   :  { %367 = vst.msk [vmem:[%s1747_s3 + $0x58] sm:$0xff] %vm355_vm2, %v1104_v7  ;;  %v326_v9 = vpop.f32.mrb[11].mxu1  ;;  %1262 = vmatpush3.bf16.msra.mxu0 %v1259_v6  ;;  %1287 = vmatpush3.bf16.msra.mxu1 %v1259_v6 }
 0x206   :  { %366 = vst.msk [vmem:[%s1747_s3 + $0x50] sm:$0xff] %vm355_vm2, %v326_v9  ;;  %v1263_v11 = vpack.c.bf16 %v1104_v7, %v326_v9 }
 0x208   :  { %v1107_v12 = vpop.f32.mrb[12].mxu1  ;;  %1264 = vmatprep.subr.bf16.mxu0 %v1263_v11  ;;  %1280 = vmatprep.subr.bf16.mxu1 %v1263_v11 }
 0x209   :  { %369 = vst.msk [vmem:[%s1747_s3 + $0x68] sm:$0xff] %vm355_vm2, %v1107_v12  ;;  %v336_v13 = vpop.f32.mrb[13].mxu1  ;;  %1266 = vmatpush3.bf16.msra.mxu0 %v1263_v11  ;;  %1288 = vmatpush3.bf16.msra.mxu1 %v1263_v11 }
 0x20a   :  { %368 = vst.msk [vmem:[%s1747_s3 + $0x60] sm:$0xff] %vm355_vm2, %v336_v13  ;;  %v1267_v14 = vpack.c.bf16 %v1107_v12, %v336_v13 }
 0x20c   :  { %v1110_v17 = vpop.f32.mrb[14].mxu1  ;;  %1268 = vmatprep.subr.bf16.mxu0 %v1267_v14  ;;  %1281 = vmatprep.subr.bf16.mxu1 %v1267_v14 }
 0x20d   :  { %371 = vst.msk [vmem:[%s1747_s3 + $0x78] sm:$0xff] %vm355_vm2, %v1110_v17  ;;  %v346_v18 = vpop.f32.mrb[15].mxu1  ;;  %1270 = vmatpush3.bf16.msra.mxu0 %v1267_v14  ;;  %1289 = vmatpush3.bf16.msra.mxu1 %v1267_v14 }
 0x20e   :  { %370 = vst.msk [vmem:[%s1747_s3 + $0x70] sm:$0xff] %vm355_vm2, %v346_v18  ;;  %v1271_v19 = vpack.c.bf16 %v1110_v17, %v346_v18  ;;  %s1322_s3 = smov [#allocation2]  }
 0x20f   :  { %s837_s20 = sshll.u32 %s1322_s3, 4  ;;  %s838_s20 = int_to_ptr.vmem [resolvable:$true] %s837_s20 }
 0x210   :  { %1272 = vmatprep.subr.bf16.mxu0 %v1271_v19  ;;  %1282 = vmatprep.subr.bf16.mxu1 %v1271_v19  ;;  %s1296_s21 = scalar_lea.vmem %s838_s20, 16  ;;  %s1300_s22 = scalar_lea.vmem %s838_s20, 32 }
 0x211   :  { %1274 = vmatpush3.bf16.msra.mxu0 %v1271_v19  ;;  %1290 = vmatpush3.bf16.msra.mxu1 %v1271_v19  ;;  %p1297_p0 = scmp.ne.s32.totalorder %s838_s20, %s1296_s21  ;;  %p1301_p1 = scmp.lt.s32.totalorder %s838_s20, %s838_s20 }
 0x212   :  { %p1302_p2 = scmp.lt.s32.totalorder %s1300_s22, %s1296_s21 }
 0x214   :  { %1144 = vmatmul.mubr.msk.f32.vlgmr.msra.gmra.mrb[16].mxu0 %vm471_vm3, %v1321_v29  ;;  %1162 = vmatmul.mubr.msk.f32.vlgmr.msra.gmra.mrb[16].mxu1 %vm483_vm4, %v1321_v29  ;;  %vm478_vm3 = vcmp.eq.s32.totalorder %v1576_v27, %v424_v21  ;;  %vm491_vm4 = vcmp.eq.s32.totalorder %v1576_v27, %v463_v22  ;;  %p1303_p3 = por %p1302_p2, %p1301_p1 }
 0x215   :  { %1146 = vmatprep.mubr.msk.f32.mxu0 %vm472_vm6, %v1321_v29  ;;  %1164 = vmatprep.mubr.msk.f32.mxu1 %vm484_vm5, %v1321_v29  ;;  %vm479_vm5 = vcmp.eq.s32.totalorder %v1576_v27, %v427_v23  ;;  %vm492_vm6 = vcmp.eq.s32.totalorder %v1576_v27, %v466_v24 }
 0x216   :  { %p1304_p4 = pnand %p1303_p3, %p1297_p0 }
 0x218   :  { %1147 = vmatmul.mubr.msk.f32.gmra.mrb[18].mxu0 %vm473_vm8, %v1321_v29  ;;  %1165 = vmatmul.mubr.msk.f32.gmra.mrb[18].mxu1 %vm485_vm7, %v1321_v29  ;;  %vm480_vm7 = vcmp.eq.s32.totalorder %v1576_v27, %v430_v40  ;;  %vm493_vm8 = vcmp.eq.s32.totalorder %v1576_v27, %v469_v41 }
 0x219   :  { %1149 = vmatprep.mubr.msk.f32.mxu0 %vm474_vm10, %v1321_v29  ;;  %1167 = vmatprep.mubr.msk.f32.mxu1 %vm486_vm9, %v1321_v29  ;;  %vm481_vm9 = vcmp.eq.s32.totalorder %v1576_v27, %v433_v42 }
 0x21c   :  { %1150 = vmatmul.mubr.msk.f32.gmra.mrb[20].mxu0 %vm475_vm12, %v1321_v29  ;;  %1168 = vmatmul.mubr.msk.f32.gmra.mrb[20].mxu1 %vm487_vm11, %v1321_v29 }
 0x21d   :  { %1152 = vmatprep.mubr.msk.f32.mxu0 %vm476_vm14, %v1321_v29  ;;  %1170 = vmatprep.mubr.msk.f32.mxu1 %vm488_vm13, %v1321_v29 }
 0x220   :  { %1153 = vmatmul.mubr.msk.f32.gmra.mrb[22].mxu0 %vm477_vm0, %v1321_v29  ;;  %1171 = vmatmul.mubr.msk.f32.gmra.mrb[22].mxu1 %vm489_vm15, %v1321_v29 }
 0x221   :  { %1155 = vmatprep.mubr.msk.f32.mxu0 %vm478_vm3, %v1321_v29  ;;  %1173 = vmatprep.mubr.msk.f32.mxu1 %vm490_vm1, %v1321_v29 }
 0x224   :  { %1156 = vmatmul.mubr.msk.f32.gmra.mrb[24].mxu0 %vm479_vm5, %v1321_v29  ;;  %1174 = vmatmul.mubr.msk.f32.gmra.mrb[24].mxu1 %vm491_vm4, %v1321_v29 }
 0x225   :  { %1158 = vmatprep.mubr.msk.f32.mxu0 %vm480_vm7, %v1321_v29  ;;  %1176 = vmatprep.mubr.msk.f32.mxu1 %vm492_vm6, %v1321_v29 }
 0x228   :  { %1159 = vmatmul.mubr.msk.f32.gmra.mrb[26].mxu0 %vm481_vm9, %v1321_v29  ;;  %1177 = vmatmul.mubr.msk.f32.gmra.mrb[26].mxu1 %vm493_vm8, %v1321_v29 }
 0x2e7   :  { %v1145_v43 = vpop.f32.mrb[16].mxu0  ;;  %v1163_v44 = vpop.f32.mrb[16].mxu1 }
 0x2e8   :  { %v728_v45 = vsub.f32 %v1145_v43, %v1163_v44  ;;  %v608_v46 = vpop.f32.mrb[17].mxu0  ;;  %v668_v47 = vpop.f32.mrb[17].mxu1 }
 0x2e9   :  { %v727_v48 = vsub.f32 %v608_v46, %v668_v47 }
 0x2ea   :  { %v740_v49 = vand.u32 2147483647, %v728_v45 }
 0x2eb   :  { %v739_v50 = vand.u32 2147483647, %v727_v48  ;;  %v1148_v51 = vpop.f32.mrb[18].mxu0  ;;  %v1166_v52 = vpop.f32.mrb[18].mxu1 }
 0x2ec   :  { %v730_v53 = vsub.f32 %v1148_v51, %v1166_v52  ;;  %v618_v54 = vpop.f32.mrb[19].mxu0  ;;  %v678_v55 = vpop.f32.mrb[19].mxu1  ;;  %v754_v25 = vsel %vm355_vm2, %v740_v49, 0.0 }
 0x2ed   :  { %v729_v26 = vsub.f32 %v618_v54, %v678_v55  ;;  %755 = vadd.xlane.f32.xlu1 %v754_v25  ;;  %v751_v27 = vsel %vm355_vm2, %v739_v50, 0.0 }
 0x2ee   :  { %v742_v28 = vand.u32 2147483647, %v730_v53  ;;  %752 = vadd.xlane.f32.xlu0 %v751_v27 }
 0x2ef   :  { %v1151_v29 = vpop.f32.mrb[20].mxu0  ;;  %v1169_v30 = vpop.f32.mrb[20].mxu1  ;;  %v741_v35 = vand.u32 2147483647, %v729_v26 }
 0x2f0   :  { %v732_v31 = vsub.f32 %v1151_v29, %v1169_v30  ;;  %v628_v32 = vpop.f32.mrb[21].mxu0  ;;  %v688_v33 = vpop.f32.mrb[21].mxu1  ;;  %v760_v34 = vsel %vm355_vm2, %v742_v28, 0.0 }
 0x2f1   :  { %v731_v36 = vsub.f32 %v628_v32, %v688_v33  ;;  %v757_v62 = vsel %vm355_vm2, %v741_v35, 0.0 }
 0x2f2   :  { %v744_v37 = vand.u32 2147483647, %v732_v31  ;;  %761 = vadd.xlane.f32.xlu0 %v760_v34 }
 0x2f3   :  { %v1154_v38 = vpop.f32.mrb[22].mxu0  ;;  %v1172_v39 = vpop.f32.mrb[22].mxu1  ;;  %v743_v60 = vand.u32 2147483647, %v731_v36 }
 0x2f4   :  { %v734_v56 = vsub.f32 %v1154_v38, %v1172_v39  ;;  %v638_v57 = vpop.f32.mrb[23].mxu0  ;;  %v698_v58 = vpop.f32.mrb[23].mxu1  ;;  %v766_v59 = vsel %vm355_vm2, %v744_v37, 0.0 }
 0x2f5   :  { %v733_v61 = vsub.f32 %v638_v57, %v698_v58  ;;  %767 = vadd.xlane.f32.xlu1 %v766_v59  ;;  %v763_v6 = vsel %vm355_vm2, %v743_v60, 0.0 }
 0x2f6   :  { %758 = vadd.xlane.f32.xlu0 %v757_v62  ;;  %v746_v16 = vand.u32 2147483647, %v734_v56 }
 0x2f7   :  { %v745_v63 = vand.u32 2147483647, %v733_v61  ;;  %v1157_v0 = vpop.f32.mrb[24].mxu0  ;;  %v1175_v1 = vpop.f32.mrb[24].mxu1 }
 0x2f8   :  { %v736_v2 = vsub.f32 %v1157_v0, %v1175_v1  ;;  %v648_v3 = vpop.f32.mrb[25].mxu0  ;;  %v708_v4 = vpop.f32.mrb[25].mxu1  ;;  %v772_v21 = vsel %vm355_vm2, %v746_v16, 0.0 }
 0x2f9   :  { %v735_v5 = vsub.f32 %v648_v3, %v708_v4  ;;  %v769_v7 = vsel %vm355_vm2, %v745_v63, 0.0 }
 0x2fa   :  { %v748_v8 = vand.u32 2147483647, %v736_v2  ;;  %764 = vadd.xlane.f32.xlu0 %v763_v6  ;;  %770 = vadd.xlane.f32.xlu1 %v769_v7 }
 0x2fb   :  { %v747_v9 = vand.u32 2147483647, %v735_v5  ;;  %v1160_v10 = vpop.f32.mrb[26].mxu0  ;;  %v1178_v11 = vpop.f32.mrb[26].mxu1 }
 0x2fc   :  { %v738_v12 = vsub.f32 %v1160_v10, %v1178_v11  ;;  %v658_v13 = vpop.f32.mrb[27].mxu0  ;;  %v718_v14 = vpop.f32.mrb[27].mxu1  ;;  %v778_v15 = vsel %vm355_vm2, %v748_v8, 0.0 }
 0x2fd   :  { %v737_v17 = vsub.f32 %v658_v13, %v718_v14  ;;  %v775_v18 = vsel %vm355_vm2, %v747_v9, 0.0 }
 0x2fe   :  { %779 = vadd.xlane.f32.xlu1 %v778_v15  ;;  %776 = vadd.xlane.f32.xlu0 %v775_v18  ;;  %v750_v20 = vand.u32 2147483647, %v738_v12 }
 0x2ff   :  { %v749_v19 = vand.u32 2147483647, %v737_v17 }
 0x300   :  { %v784_v23 = vsel %vm355_vm2, %v750_v20, 0.0 }
 0x301   :  { %v781_v22 = vsel %vm355_vm2, %v749_v19, 0.0  ;;  %vm827_vm2 = vcmask 0  }
 0x302   :  { %773 = vadd.xlane.f32.xlu1 %v772_v21  ;;  %782 = vadd.xlane.f32.xlu0 %v781_v22 }
 0x306   :  { %785 = vadd.xlane.f32.xlu0 %v784_v23 }
 0x37a   :  { %v756_v40 = vpop.xlane.xlu1 %755 }
 0x37b   :  { %v753_v24 = vpop.xlane.xlu0 %752  ;;  %v788_v44 = vadd.f32 3.0, %v756_v40 }
 0x37c   :  { %v787_v45 = vadd.f32 3.0, %v753_v24 }
 0x37f   :  { %v762_v41 = vpop.xlane.xlu0 %761 }
 0x380   :  { %v790_v27 = vadd.f32 3.0, %v762_v41 }
 0x382   :  { %v768_v42 = vpop.xlane.xlu1 %767 }
 0x383   :  { %v759_v43 = vpop.xlane.xlu0 %758  ;;  %v792_v48 = vsub.f32 %v788_v44, %v768_v42 }
 0x384   :  { %v789_v50 = vadd.f32 3.0, %v759_v43 }
 0x385   :  { %v796_v55 = vmax.f32 %v792_v48, 0.0 }
 0x387   :  { %v765_v46 = vpop.xlane.xlu0 %764  ;;  %v771_v47 = vpop.xlane.xlu1 %770 }
 0x388   :  { %v791_v49 = vsub.f32 %v787_v45, %v765_v46  ;;  %v793_v52 = vsub.f32 %v789_v50, %v771_v47 }
 0x38a   :  { %v795_v51 = vmax.f32 %v791_v49, 0.0  ;;  %v797_v29 = vmax.f32 %v793_v52, 0.0 }
 0x38b   :  { %v780_v53 = vpop.xlane.xlu1 %779  ;;  %v777_v54 = vpop.xlane.xlu0 %776 }
 0x38c   :  { %v809_v25 = vsub.f32 %v788_v44, %v780_v53  ;;  %v808_v26 = vsub.f32 %v787_v45, %v777_v54  ;;  %v799_v28 = vadd.f32 %v796_v55, %v795_v51 }
 0x38e   :  { %v813_v32 = vmax.f32 %v809_v25, 0.0  ;;  %v812_v33 = vmax.f32 %v808_v26, 0.0  ;;  %v800_v36 = vadd.f32 %v799_v28, %v797_v29 }
 0x38f   :  { %v774_v30 = vpop.xlane.xlu1 %773  ;;  %v783_v31 = vpop.xlane.xlu0 %782 }
 0x390   :  { %v794_v34 = vsub.f32 %v790_v27, %v774_v30  ;;  %v810_v35 = vsub.f32 %v789_v50, %v783_v31  ;;  %v816_v56 = vadd.f32 %v813_v32, %v812_v33 }
 0x392   :  { %v798_v37 = vmax.f32 %v794_v34, 0.0  ;;  %v814_v38 = vmax.f32 %v810_v35, 0.0 }
 0x393   :  { %v786_v39 = vpop.xlane.xlu0 %785 }
 0x394   :  { %v801_v57 = vadd.f32 %v800_v36, %v798_v37  ;;  %v811_v58 = vsub.f32 %v790_v27, %v786_v39  ;;  %v817_v60 = vadd.f32 %v816_v56, %v814_v38 }
 0x396   :  { %v802_v59 = vrot.slane %v801_v57, 4  ;;  %v815_v61 = vmax.f32 %v811_v58, 0.0 }
 0x398   :  { %v803_v62 = vadd.f32 %v802_v59, %v801_v57  ;;  %v818_v63 = vadd.f32 %v817_v60, %v815_v61 }
 0x39a   :  { %v804_v0 = vrot.slane %v803_v62, 2  ;;  %v819_v1 = vrot.slane %v818_v63, 4 }
 0x39c   :  { %v805_v2 = vadd.f32 %v804_v0, %v803_v62  ;;  %v820_v3 = vadd.f32 %v819_v1, %v818_v63 }
 0x39e   :  { %v821_v4 = vrot.slane %v820_v3, 2  ;;  %v806_v6 = vrot.slane %v805_v2, 1 }
 0x3a0   :  { %v822_v5 = vadd.f32 %v821_v4, %v820_v3  ;;  %v807_v8 = vadd.f32 %v806_v6, %v805_v2 }
 0x3a2   :  { %v823_v7 = vrot.slane %v822_v5, 1 }
 0x3a4   :  { %v824_v9 = vadd.f32 %v823_v7, %v822_v5 }
 0x3a6   :  { %v825_v10 = vadd.f32 %v824_v9, %v807_v8 }
 0x3a8   :  { %v826_v11 = vmul.f32 0.015625, %v825_v10 }
 0x3aa   :  { %828 = vst.msk [vmem:[#allocation2] sm:$0x1] %vm827_vm2, %v826_v11 }
 0x3ab   :  { %1307 = shalt.err (!%p1304_p4)
}
 0x3ac   :  { %s1308_s25 = scalar_lea.hbm %s1748_s4, 16 }
 0x3ad   :  { %p1309_p5 = scmp.ne.s32.totalorder %s1748_s4, %s1308_s25  ;;  %p1312_p6 = scmp.lt.u32.totalorder %s1308_s25, %s1748_s4 }
 0x3af   :  { %p1314_p7 = pnand %p1312_p6, %p1309_p5 }
 0x3b1   :  { %1317 = shalt.err (!%p1314_p7)
}
 0x3b2   :  { %840 = dma.vmem_to_hbm [thread:$0]  %s838_s20, 16, %s1748_s4, [#allocation3]  }
 0x3b3   :  { %1318 = dma.done.wait [#allocation3], 16  }
 0x3b4   :  { %1319 = vsyncadd [#allocation3], 4294967280 }
 0x3b5   :  { %846 = vsyncpa [#allocation3], 1 }

</bundles_post_ra>
